<compile_context>
chip_gen: v6e
topology: v6e:2x2x1
jax: 0.10.0
libtpu: 0.0.40
codegen_flags: <defaults>
</compile_context>

<pallas_src>
import functools

import jax
import jax.numpy as jnp
from jax.experimental import pallas as pl
from jax.experimental.pallas import tpu as pltpu

HIDDEN = 32
IN_FEATURES = 3
OUT_FEATURES = 1
LEAKY_SLOPE = 0.01      # PyTorch nn.LeakyReLU default negative_slope
LANE = 128              # TPU vreg lane width
CHUNK = 512             # in-kernel sub-chunk of the batch tile (lanes)
MAX_TILE = 2048         # max batch-tile (lanes) per grid step


def _leaky_relu(x):
    return jnp.where(x > 0, x, LEAKY_SLOPE * x)


def _mlp_kernel(l_ref, dl_ref, a_ref,
                w1_ref, b1_ref, w2_ref, b2_ref, w3_ref, b3_ref,
                w4_ref, b4_ref, o_ref, *, chunk, n_chunks):
    """One (1, tile) batch-tile of the MLP, batch on the lane axis.

    Activations are (features, batch_chunk). The tile is processed in
    `n_chunks` static sub-chunks of `chunk` lanes (static lane slices) so
    live activations stay in vregs while the BlockSpec tile stays large.
    """
    w1 = w1_ref[...]          # (32, 3)  f32
    b1 = b1_ref[...]          # (32, 1)  f32
    w2 = w2_ref[...]          # (32, 32) f32
    b2 = b2_ref[...]          # (32, 1)  f32
    w3 = w3_ref[...]          # (32, 32) f32
    b3 = b3_ref[...]          # (32, 1)  f32
    w4 = w4_ref[...]          # (32, 1)  f32
    b4 = b4_ref[...]          # (1, 1)   f32

    for c in range(n_chunks):                     # short static unrolled loop
        sl = pl.ds(c * chunk, chunk)
        xl = l_ref[:, sl]                         # (1, CH)
        xv = dl_ref[:, sl]
        xa = a_ref[:, sl]

        # Layer 1 (K=3) on the VPU: three broadcast FMAs, batch on lanes.
        h = (w1[:, 0:1] * xl + w1[:, 1:2] * xv + w1[:, 2:3] * xa + b1)
        h = _leaky_relu(h)                        # (32, CH) f32

        # Layers 2-3: f32 matmuls (tiny 32x32 contractions), f32 accumulate.
        h = jnp.dot(w2, h, preferred_element_type=jnp.float32) + b2
        h = _leaky_relu(h)
        h = jnp.dot(w3, h, preferred_element_type=jnp.float32) + b3
        h = _leaky_relu(h)

        # Layer 4 (M=1): sublane reduction instead of a 1-row MXU matmul.
        out = jnp.sum(w4 * h, axis=0, keepdims=True) + b4     # (1, CH)
        o_ref[:, sl] = jnp.tanh(out)              # lane-dense store


def _pick_tile(batch, max_tile):
    """Batch tile (lanes): power-of-two multiple of 128, <= max_tile, and
    small enough that the grid keeps >=4 steps when the batch allows it."""
    padded = pl.cdiv(batch, LANE) * LANE
    target = max(LANE, min(max_tile, padded // 4))
    tb = LANE
    while tb * 2 <= target:
        tb *= 2
    return tb


@functools.partial(jax.jit, static_argnames=("max_tile",))
def compensational_nn_forward(L, dL_dt, a, params, max_tile=MAX_TILE):
    """JAX/Pallas equivalent of compensational_nn.forward (eval mode).

    Args:
      L, dL_dt, a: arrays of shape (B, 1) (or (B,)), float32.
      params: dict with w1..w4 stored as (in, out) and b1..b4 as (out,).
    Returns:
      (B, 1) float32 output in [-1, 1].
    """
    B = L.shape[0]
    # Batch lives on the lane axis: each input becomes a (1, B) row
    # (free metadata reshape; no (B,3) concat / extra HBM round-trip).
    rows = [v.astype(jnp.float32).reshape(1, -1) for v in (L, dL_dt, a)]

    tb = _pick_tile(B, max_tile)
    Bp = pl.cdiv(B, tb) * tb
    if Bp != B:
        rows = [jnp.pad(v, ((0, 0), (0, Bp - B))) for v in rows]

    chunk = min(CHUNK, tb)          # tb is a power-of-two multiple of 128
    n_chunks = tb // chunk

    # Weights transposed to (out, in) so the kernel computes W @ x.
    w1t = params["w1"].T.astype(jnp.float32)          # (32, 3)
    b1 = params["b1"].reshape(HIDDEN, 1).astype(jnp.float32)
    w2t = params["w2"].T.astype(jnp.float32)          # (32, 32)
    b2 = params["b2"].reshape(HIDDEN, 1).astype(jnp.float32)
    w3t = params["w3"].T.astype(jnp.float32)          # (32, 32)
    b3 = params["b3"].reshape(HIDDEN, 1).astype(jnp.float32)
    w4c = params["w4"].reshape(HIDDEN, OUT_FEATURES).astype(jnp.float32)
    b4 = params["b4"].reshape(1, 1).astype(jnp.float32)

    row_spec = pl.BlockSpec((1, tb), lambda i: (0, i))
    full = lambda shape: pl.BlockSpec(shape, lambda i: (0, 0))

    out = pl.pallas_call(
        functools.partial(_mlp_kernel, chunk=chunk, n_chunks=n_chunks),
        out_shape=jax.ShapeDtypeStruct((1, Bp), jnp.float32),
        grid_spec=pltpu.PrefetchScalarGridSpec(
            num_scalar_prefetch=0,
            grid=(Bp // tb,),
            in_specs=[
                row_spec, row_spec, row_spec,                    # L, dL/dt, a
                full((HIDDEN, IN_FEATURES)), full((HIDDEN, 1)),  # layer 1
                full((HIDDEN, HIDDEN)),      full((HIDDEN, 1)),  # layer 2
                full((HIDDEN, HIDDEN)),      full((HIDDEN, 1)),  # layer 3
                full((HIDDEN, OUT_FEATURES)), full((1, 1)),      # layer 4
            ],
            out_specs=row_spec,            # (1, tb): lane-dense output
        ),
        compiler_params=pltpu.CompilerParams(
            dimension_semantics=("parallel",)),
    )(*rows, w1t, b1, w2t, b2, w3t, b3, w4c, b4)

    return out[0, :B].reshape(B, 1)


def init_params(key):
    """Deterministic init mimicking PyTorch nn.Linear default:
    U(-1/sqrt(fan_in), 1/sqrt(fan_in)) for weights and biases."""
    dims = [(IN_FEATURES, HIDDEN), (HIDDEN, HIDDEN),
            (HIDDEN, HIDDEN), (HIDDEN, OUT_FEATURES)]
    params = {}
    for idx, (fan_in, fan_out) in enumerate(dims, start=1):
        key, kw, kb = jax.random.split(key, 3)
        bound = 1.0 / jnp.sqrt(float(fan_in))
        # stored as (in, out); PyTorch stores (out, in)
        params[f"w{idx}"] = jax.random.uniform(
            kw, (fan_in, fan_out), jnp.float32, -bound, bound)
        params[f"b{idx}"] = jax.random.uniform(
            kb, (fan_out,), jnp.float32, -bound, bound)
    return params


def _reference_forward(L, dL_dt, a, params):
    """Pure-JAX f32 reference for correctness checking."""
    x = jnp.concatenate([L, dL_dt, a], axis=1).astype(jnp.float32)
    h = _leaky_relu(x @ params["w1"] + params["b1"])
    h = _leaky_relu(h @ params["w2"] + params["b2"])
    h = _leaky_relu(h @ params["w3"] + params["b3"])
    return jnp.tanh(h @ params["w4"] + params["b4"])


if __name__ == "__main__":
    key = jax.random.PRNGKey(0)
    key, k_params, kL, kV, kA = jax.random.split(key, 5)

    params = init_params(k_params)

    B = 100  # small batch; also exercises lane padding (100 -> 128)
    L = jax.random.uniform(kL, (B, 1), jnp.float32, 0.5, 1.5)      # length
    dL_dt = jax.random.normal(kV, (B, 1), jnp.float32) * 0.1       # speed
    a = jax.random.uniform(kA, (B, 1), jnp.float32, 0.0, 1.0)      # activation

    out = compensational_nn_forward(L, dL_dt, a, params)
    out = jax.block_until_ready(out)

    ref = _reference_forward(L, dL_dt, a, params)
    assert out.shape == (B, 1)
    assert bool(jnp.all(jnp.isfinite(out)))
    # All-f32 compute path: tight tolerance vs the f32 reference.
    assert jnp.allclose(out, ref, atol=1e-5, rtol=1e-5), "mismatch vs reference"

    print("KERNEL_OK")
</pallas_src>

<mosaic_0001>
module attributes {stable_mosaic.version = 11 : i64} {
  func.func @_mlp_kernel(%arg0: i32, %arg1: memref<1x128xf32, #tpu.memory_space<vmem>>, %arg2: memref<1x128xf32, #tpu.memory_space<vmem>>, %arg3: memref<1x128xf32, #tpu.memory_space<vmem>>, %arg4: memref<32x3xf32, #tpu.memory_space<vmem>>, %arg5: memref<32x1xf32, #tpu.memory_space<vmem>>, %arg6: memref<32x32xf32, #tpu.memory_space<vmem>>, %arg7: memref<32x1xf32, #tpu.memory_space<vmem>>, %arg8: memref<32x32xf32, #tpu.memory_space<vmem>>, %arg9: memref<32x1xf32, #tpu.memory_space<vmem>>, %arg10: memref<32x1xf32, #tpu.memory_space<vmem>>, %arg11: memref<1x1xf32, #tpu.memory_space<vmem>>, %arg12: memref<1x128xf32, #tpu.memory_space<vmem>>) attributes {dimension_semantics = [#tpu.dimension_semantics<parallel>], iteration_bounds = array<i64: 1>, scalar_prefetch = 0 : i64, scratch_operands = 0 : i64, tpu.core_type = #tpu.core_type<tc>, window_params = [{transform_indices = @transform_0, window_bounds = array<i64: 1, 128>}, {transform_indices = @transform_1, window_bounds = array<i64: 1, 128>}, {transform_indices = @transform_2, window_bounds = array<i64: 1, 128>}, {pipeline_mode = #tpu.pipeline_mode<synchronous>, transform_indices = @transform_3, window_bounds = array<i64: 32, 3>}, {pipeline_mode = #tpu.pipeline_mode<synchronous>, transform_indices = @transform_4, window_bounds = array<i64: 32, 1>}, {pipeline_mode = #tpu.pipeline_mode<synchronous>, transform_indices = @transform_5, window_bounds = array<i64: 32, 32>}, {pipeline_mode = #tpu.pipeline_mode<synchronous>, transform_indices = @transform_6, window_bounds = array<i64: 32, 1>}, {pipeline_mode = #tpu.pipeline_mode<synchronous>, transform_indices = @transform_7, window_bounds = array<i64: 32, 32>}, {pipeline_mode = #tpu.pipeline_mode<synchronous>, transform_indices = @transform_8, window_bounds = array<i64: 32, 1>}, {pipeline_mode = #tpu.pipeline_mode<synchronous>, transform_indices = @transform_9, window_bounds = array<i64: 32, 1>}, {pipeline_mode = #tpu.pipeline_mode<synchronous>, transform_indices = @transform_10, window_bounds = array<i64: 1, 1>}, {transform_indices = @transform_11, window_bounds = array<i64: 1, 128>}]} {
    %c0 = arith.constant 0 : index
    %c0_0 = arith.constant 0 : index
    %0 = vector.load %arg4[%c0, %c0_0] : memref<32x3xf32, #tpu.memory_space<vmem>>, vector<32x3xf32>
    %c0_1 = arith.constant 0 : index
    %c0_2 = arith.constant 0 : index
    %1 = vector.load %arg5[%c0_1, %c0_2] : memref<32x1xf32, #tpu.memory_space<vmem>>, vector<32x1xf32>
    %c0_3 = arith.constant 0 : index
    %c0_4 = arith.constant 0 : index
    %2 = vector.load %arg6[%c0_3, %c0_4] : memref<32x32xf32, #tpu.memory_space<vmem>>, vector<32x32xf32>
    %c0_5 = arith.constant 0 : index
    %c0_6 = arith.constant 0 : index
    %3 = vector.load %arg7[%c0_5, %c0_6] : memref<32x1xf32, #tpu.memory_space<vmem>>, vector<32x1xf32>
    %c0_7 = arith.constant 0 : index
    %c0_8 = arith.constant 0 : index
    %4 = vector.load %arg8[%c0_7, %c0_8] : memref<32x32xf32, #tpu.memory_space<vmem>>, vector<32x32xf32>
    %c0_9 = arith.constant 0 : index
    %c0_10 = arith.constant 0 : index
    %5 = vector.load %arg9[%c0_9, %c0_10] : memref<32x1xf32, #tpu.memory_space<vmem>>, vector<32x1xf32>
    %c0_11 = arith.constant 0 : index
    %c0_12 = arith.constant 0 : index
    %6 = vector.load %arg10[%c0_11, %c0_12] : memref<32x1xf32, #tpu.memory_space<vmem>>, vector<32x1xf32>
    %c0_13 = arith.constant 0 : index
    %c0_14 = arith.constant 0 : index
    %7 = vector.load %arg11[%c0_13, %c0_14] : memref<1x1xf32, #tpu.memory_space<vmem>>, vector<1x1xf32>
    %c0_15 = arith.constant 0 : index
    %c0_16 = arith.constant 0 : index
    %8 = vector.load %arg1[%c0_15, %c0_16] : memref<1x128xf32, #tpu.memory_space<vmem>>, vector<1x128xf32>
    %c0_17 = arith.constant 0 : index
    %c0_18 = arith.constant 0 : index
    %9 = vector.load %arg2[%c0_17, %c0_18] : memref<1x128xf32, #tpu.memory_space<vmem>>, vector<1x128xf32>
    %c0_19 = arith.constant 0 : index
    %c0_20 = arith.constant 0 : index
    %10 = vector.load %arg3[%c0_19, %c0_20] : memref<1x128xf32, #tpu.memory_space<vmem>>, vector<1x128xf32>
    %11 = vector.extract_strided_slice %0 {offsets = [0, 0], sizes = [32, 1], strides = [1, 1]} : vector<32x3xf32> to vector<32x1xf32>
    %12 = vector.broadcast %11 : vector<32x1xf32> to vector<32x128xf32>
    %13 = vector.broadcast %8 : vector<1x128xf32> to vector<32x128xf32>
    %14 = arith.mulf %12, %13 : vector<32x128xf32>
    %15 = vector.extract_strided_slice %0 {offsets = [0, 1], sizes = [32, 1], strides = [1, 1]} : vector<32x3xf32> to vector<32x1xf32>
    %16 = vector.broadcast %15 : vector<32x1xf32> to vector<32x128xf32>
    %17 = vector.broadcast %9 : vector<1x128xf32> to vector<32x128xf32>
    %18 = arith.mulf %16, %17 : vector<32x128xf32>
    %19 = arith.addf %14, %18 : vector<32x128xf32>
    %20 = vector.extract_strided_slice %0 {offsets = [0, 2], sizes = [32, 1], strides = [1, 1]} : vector<32x3xf32> to vector<32x1xf32>
    %21 = vector.broadcast %20 : vector<32x1xf32> to vector<32x128xf32>
    %22 = vector.broadcast %10 : vector<1x128xf32> to vector<32x128xf32>
    %23 = arith.mulf %21, %22 : vector<32x128xf32>
    %24 = arith.addf %19, %23 : vector<32x128xf32>
    %25 = vector.broadcast %1 : vector<32x1xf32> to vector<32x128xf32>
    %26 = arith.addf %24, %25 : vector<32x128xf32>
    %cst = arith.constant 0.000000e+00 : f32
    %27 = vector.broadcast %cst : f32 to vector<32x128xf32>
    %28 = arith.cmpf ogt, %26, %27 : vector<32x128xf32>
    %cst_21 = arith.constant 0.00999999977 : f32
    %29 = vector.broadcast %cst_21 : f32 to vector<32x128xf32>
    %30 = arith.mulf %29, %26 : vector<32x128xf32>
    %31 = arith.select %28, %26, %30 : vector<32x128xi1>, vector<32x128xf32>
    %cst_22 = arith.constant dense<0.000000e+00> : vector<32x128xf32>
    %32 = tpu.matmul %2, %31, %cst_22 {dimension_numbers = #tpu.dot_dimension_numbers<[1], [0], [0], [1], [0, 0, 1, 1], [], []>} : vector<32x32xf32>, vector<32x128xf32>, vector<32x128xf32> -> vector<32x128xf32>
    %33 = vector.broadcast %3 : vector<32x1xf32> to vector<32x128xf32>
    %34 = arith.addf %32, %33 : vector<32x128xf32>
    %cst_23 = arith.constant 0.000000e+00 : f32
    %35 = vector.broadcast %cst_23 : f32 to vector<32x128xf32>
    %36 = arith.cmpf ogt, %34, %35 : vector<32x128xf32>
    %cst_24 = arith.constant 0.00999999977 : f32
    %37 = vector.broadcast %cst_24 : f32 to vector<32x128xf32>
    %38 = arith.mulf %37, %34 : vector<32x128xf32>
    %39 = arith.select %36, %34, %38 : vector<32x128xi1>, vector<32x128xf32>
    %cst_25 = arith.constant dense<0.000000e+00> : vector<32x128xf32>
    %40 = tpu.matmul %4, %39, %cst_25 {dimension_numbers = #tpu.dot_dimension_numbers<[1], [0], [0], [1], [0, 0, 1, 1], [], []>} : vector<32x32xf32>, vector<32x128xf32>, vector<32x128xf32> -> vector<32x128xf32>
    %41 = vector.broadcast %5 : vector<32x1xf32> to vector<32x128xf32>
    %42 = arith.addf %40, %41 : vector<32x128xf32>
    %cst_26 = arith.constant 0.000000e+00 : f32
    %43 = vector.broadcast %cst_26 : f32 to vector<32x128xf32>
    %44 = arith.cmpf ogt, %42, %43 : vector<32x128xf32>
    %cst_27 = arith.constant 0.00999999977 : f32
    %45 = vector.broadcast %cst_27 : f32 to vector<32x128xf32>
    %46 = arith.mulf %45, %42 : vector<32x128xf32>
    %47 = arith.select %44, %42, %46 : vector<32x128xi1>, vector<32x128xf32>
    %48 = vector.broadcast %6 : vector<32x1xf32> to vector<32x128xf32>
    %49 = arith.mulf %48, %47 : vector<32x128xf32>
    %cst_28 = arith.constant dense<0.000000e+00> : vector<128xf32>
    %50 = vector.multi_reduction <add>, %49, %cst_28 [0] : vector<32x128xf32> to vector<128xf32>
    %51 = vector.shape_cast %50 : vector<128xf32> to vector<1x128xf32>
    %52 = vector.broadcast %7 : vector<1x1xf32> to vector<1x128xf32>
    %53 = arith.addf %51, %52 : vector<1x128xf32>
    %54 = math.tanh %53 : vector<1x128xf32>
    %c0_29 = arith.constant 0 : index
    %c0_30 = arith.constant 0 : index
    %55 = vector.load %arg12[%c0_29, %c0_30] : memref<1x128xf32, #tpu.memory_space<vmem>>, vector<1x128xf32>
    tpu.vector_store %arg12[%c0_29, %c0_30], %54 {strides = array<i32>} : memref<1x128xf32, #tpu.memory_space<vmem>>, vector<1x128xf32>,
    return
  }
  func.func @transform_0(%arg0: i32) -> (i32, i32) {
    %c0_i32 = arith.constant 0 : i32
    %c0_i32_0 = arith.constant 0 : i32
    return %c0_i32, %arg0 : i32, i32
  }
  func.func @transform_1(%arg0: i32) -> (i32, i32) {
    %c0_i32 = arith.constant 0 : i32
    %c0_i32_0 = arith.constant 0 : i32
    return %c0_i32, %arg0 : i32, i32
  }
  func.func @transform_2(%arg0: i32) -> (i32, i32) {
    %c0_i32 = arith.constant 0 : i32
    %c0_i32_0 = arith.constant 0 : i32
    return %c0_i32, %arg0 : i32, i32
  }
  func.func @transform_3(%arg0: i32) -> (i32, i32) {
    %c0_i32 = arith.constant 0 : i32
    %c0_i32_0 = arith.constant 0 : i32
    %c0_i32_1 = arith.constant 0 : i32
    return %c0_i32, %c0_i32_0 : i32, i32
  }
  func.func @transform_4(%arg0: i32) -> (i32, i32) {
    %c0_i32 = arith.constant 0 : i32
    %c0_i32_0 = arith.constant 0 : i32
    %c0_i32_1 = arith.constant 0 : i32
    return %c0_i32, %c0_i32_0 : i32, i32
  }
  func.func @transform_5(%arg0: i32) -> (i32, i32) {
    %c0_i32 = arith.constant 0 : i32
    %c0_i32_0 = arith.constant 0 : i32
    %c0_i32_1 = arith.constant 0 : i32
    return %c0_i32, %c0_i32_0 : i32, i32
  }
  func.func @transform_6(%arg0: i32) -> (i32, i32) {
    %c0_i32 = arith.constant 0 : i32
    %c0_i32_0 = arith.constant 0 : i32
    %c0_i32_1 = arith.constant 0 : i32
    return %c0_i32, %c0_i32_0 : i32, i32
  }
  func.func @transform_7(%arg0: i32) -> (i32, i32) {
    %c0_i32 = arith.constant 0 : i32
    %c0_i32_0 = arith.constant 0 : i32
    %c0_i32_1 = arith.constant 0 : i32
    return %c0_i32, %c0_i32_0 : i32, i32
  }
  func.func @transform_8(%arg0: i32) -> (i32, i32) {
    %c0_i32 = arith.constant 0 : i32
    %c0_i32_0 = arith.constant 0 : i32
    %c0_i32_1 = arith.constant 0 : i32
    return %c0_i32, %c0_i32_0 : i32, i32
  }
  func.func @transform_9(%arg0: i32) -> (i32, i32) {
    %c0_i32 = arith.constant 0 : i32
    %c0_i32_0 = arith.constant 0 : i32
    %c0_i32_1 = arith.constant 0 : i32
    return %c0_i32, %c0_i32_0 : i32, i32
  }
  func.func @transform_10(%arg0: i32) -> (i32, i32) {
    %c0_i32 = arith.constant 0 : i32
    %c0_i32_0 = arith.constant 0 : i32
    %c0_i32_1 = arith.constant 0 : i32
    return %c0_i32, %c0_i32_0 : i32, i32
  }
  func.func @transform_11(%arg0: i32) -> (i32, i32) {
    %c0_i32 = arith.constant 0 : i32
    %c0_i32_0 = arith.constant 0 : i32
    return %c0_i32, %arg0 : i32, i32
  }
}

</mosaic_0001>

<bundles_post_ra>
// kernel: compensational_nn_forward.1
= control target key start
LH: loop header
LB: loop body
LE: loop exit
PB: predicated region body
PF: predicated region fallthrough
CT: control target
= control target key end

     0   :  { %v578_v0 = vmov 1   ;;  %v579_v1 = vmov 0   ;;  %v580_v6 = vmov 2   ;;  %vm218_vm0 = vcmask 261120   ;;  %s748_s3 = inlined_call_operand.vmem [shape: f32[32,3], index: 3, kind: input, shape index: {}]   ;;  %s749_s10 = inlined_call_operand.<no memory space> [shape: f32[1,1], index: 10, kind: input, shape index: {}]   ;;  %s750_s4 = inlined_call_operand.vmem [shape: f32[32,1], index: 4, kind: input, shape index: {}]   ;;  %s751_s6 = inlined_call_operand.vmem [shape: f32[32,1], index: 6, kind: input, shape index: {}]   ;;  %s752_s8 = inlined_call_operand.vmem [shape: f32[32,1], index: 8, kind: input, shape index: {}]   ;;  %s753_s9 = inlined_call_operand.vmem [shape: f32[32,1], index: 9, kind: input, shape index: {}]   ;;  %s754_s5 = inlined_call_operand.vmem [shape: f32[32,32], index: 5, kind: input, shape index: {}]   ;;  %s755_s1 = inlined_call_operand.vmem [shape: f32[1,128], index: 1, kind: input, shape index: {}]   ;;  %s756_s0 = inlined_call_operand.vmem [shape: f32[1,128], index: 0, kind: input, shape index: {}]   ;;  %s757_s2 = inlined_call_operand.vmem [shape: f32[1,128], index: 2, kind: input, shape index: {}]   ;;  %s758_s7 = inlined_call_operand.vmem [shape: f32[32,32], index: 7, kind: input, shape index: {}]   ;;  %s759_s11 = inlined_call_operand.vmem [shape: f32[1,128], index: 11, kind: output, shape index: {}]  }
   0x1   :  { %564 = vset.pattern.permute.xlu0 %v578_v0  ;;  %565 = vset.pattern.permute.xlu1 %v579_v1  ;;  %v43_v2 = vld [vmem:[%s748_s3 + $0x18] sm:$0xff]  ;;  %v42_v3 = vld [vmem:[%s748_s3 + $0x10] sm:$0xff]  ;;  %v16_v4 = vstv %s749_s10  ;;  %v41_v5 = vld [vmem:[%s748_s3 + $0x8] sm:$0xff] }
   0x2   :  { %115 = vperm.xlu0 %564, %v43_v2   ;;  %84 = vperm.xlu1 %565, %v42_v3   ;;  %17 = vst [vmem:[#allocation2] sm:$0x1] %v16_v4  ;;  %v40_v7 = vld [vmem:[%s748_s3] sm:$0xff]  ;;  %v46_v8 = vld [vmem:[%s750_s4 + $0x10] sm:$0xff]  ;;  %v55_v9 = vld [vmem:[%s751_s6 + $0x18] sm:$0xff] }
   0x3   :  { %v53_v10 = vld [vmem:[%s751_s6 + $0x8] sm:$0xff]  ;;  %v47_v11 = vld [vmem:[%s750_s4 + $0x18] sm:$0xff]  ;;  %v60_v12 = vld [vmem:[%s752_s8] sm:$0xff] }
   0x4   :  { %v62_v13 = vld [vmem:[%s752_s8 + $0x10] sm:$0xff]  ;;  %v45_v14 = vld [vmem:[%s750_s4 + $0x8] sm:$0xff]  ;;  %v64_v15 = vld [vmem:[%s753_s9] sm:$0xff] }
   0x5   :  { %v44_v16 = vld [vmem:[%s750_s4] sm:$0xff]  ;;  %v66_v17 = vld [vmem:[%s753_s9 + $0x10] sm:$0xff]  ;;  %v61_v22 = vld [vmem:[%s752_s8 + $0x8] sm:$0xff] }
   0x6   :  { %571 = vset.pattern.permute.xlu0 %v580_v6  ;;  %566 = vset.pattern.permute.xlu1 %v578_v0  ;;  %v54_v18 = vld [vmem:[%s751_s6 + $0x10] sm:$0xff]  ;;  %v48_v19 = vld [vmem:[%s754_s5] sm:$0xff]  ;;  %v63_v23 = vld [vmem:[%s752_s8 + $0x18] sm:$0xff] }
   0x7   :  { %111 = vperm.xlu1 %566, %v42_v3   ;;  %137 = vperm.xlu0 %571, %v41_v5   ;;  %v52_v21 = vld [vmem:[%s751_s6] sm:$0xff]  ;;  %v65_v24 = vld [vmem:[%s753_s9 + $0x8] sm:$0xff]  ;;  %v67_v25 = vld [vmem:[%s753_s9 + $0x18] sm:$0xff] }
   0x8   :  { %541 = vmatprep.mubr.msk.f32.mxu0 %vm218_vm0, %v48_v19  ;;  %v507_v33 = vld [vmem:[%s755_s1] ss:$0 sm:$0xff] }
   0x9   :  { %v68_v20 = vld [vmem:[#allocation2] sm:$0x1] }
   0xa   :  { %v506_v35 = vld [vmem:[%s756_s0] ss:$0 sm:$0xff] }
   0xb   :  { %567 = vset.pattern.permute.xlu1 %v580_v6  ;;  %572 = vset.pattern.permute.xlu0 %v579_v1  ;;  %v508_v37 = vld [vmem:[%s757_s2] ss:$0 sm:$0xff] }
   0xc   :  { %145 = vperm.xlu1 %567, %v43_v2   ;;  %89 = vperm.xlu0 %572, %v43_v2  }
  0x10   :  { %568 = vset.pattern.permute.xlu1 %v578_v0  ;;  %79 = vperm.xlu0 %572, %v41_v5  }
  0x11   :  { %107 = vperm.xlu1 %568, %v41_v5  }
  0x14   :  { %74 = vperm.xlu0 %572, %v40_v7  }
  0x15   :  { %569 = vset.pattern.permute.xlu1 %v580_v6 }
  0x16   :  { %141 = vperm.xlu1 %569, %v42_v3  }
  0x18   :  { %174 = vperm.xlu0 %572, %v46_v8  }
  0x1a   :  { %570 = vset.pattern.permute.xlu1 %v578_v0 }
  0x1b   :  { %103 = vperm.xlu1 %570, %v40_v7  }
  0x1c   :  { %215 = vperm.xlu0 %572, %v55_v9  }
  0x1f   :  { %573 = vset.pattern.permute.xlu1 %v579_v1 }
  0x20   :  { %205 = vperm.xlu0 %572, %v53_v10   ;;  %179 = vperm.xlu1 %573, %v47_v11  }
  0x24   :  { %330 = vperm.xlu0 %572, %v60_v12   ;;  %574 = vset.pattern.permute.xlu1 %v580_v6 }
  0x25   :  { %133 = vperm.xlu1 %574, %v40_v7  }
  0x28   :  { %340 = vperm.xlu0 %572, %v62_v13   ;;  %v49_v13 = vld [vmem:[%s754_s5 + $0x8] sm:$0xff] }
  0x29   :  { %575 = vset.pattern.permute.xlu1 %v579_v1 }
  0x2a   :  { %169 = vperm.xlu1 %575, %v45_v14   ;;  %v50_v14 = vld [vmem:[%s754_s5 + $0x10] sm:$0xff] }
  0x2c   :  { %459 = vperm.xlu0 %572, %v64_v15   ;;  %v51_v15 = vld [vmem:[%s754_s5 + $0x18] sm:$0xff] }
  0x2e   :  { %164 = vperm.xlu1 %575, %v44_v16   ;;  %v56_v16 = vld [vmem:[%s758_s7] sm:$0xff] }
  0x2f   :  { %555 = vmatprep.mubr.msk.f32.mxu1 %vm218_vm0, %v56_v16 }
  0x30   :  { %469 = vperm.xlu0 %572, %v66_v17  }
  0x32   :  { %210 = vperm.xlu1 %575, %v54_v18  }
  0x34   :  { %492 = vperm.xlu0 %572, %v68_v20  }
  0x36   :  { %200 = vperm.xlu1 %575, %v52_v21  }
  0x3a   :  { %335 = vperm.xlu1 %575, %v61_v22  }
  0x3e   :  { %345 = vperm.xlu1 %575, %v63_v23  }
  0x42   :  { %464 = vperm.xlu1 %575, %v65_v24  }
  0x46   :  { %474 = vperm.xlu1 %575, %v67_v25  }
  0x7d   :  { %v85_v26 = vpop.permute.xlu1 %84  ;;  %v116_v27 = vpop.permute.xlu0 %115 }
  0x7e   :  { %v100_v39 = vmul.f32 %v506_v35, %v85_v26  ;;  %v127_v40 = vmul.f32 %v507_v33, %v116_v27 }
  0x82   :  { %v112_v28 = vpop.permute.xlu1 %111  ;;  %v138_v29 = vpop.permute.xlu0 %137 }
  0x83   :  { %v126_v36 = vmul.f32 %v507_v33, %v112_v28  ;;  %v155_v58 = vmul.f32 %v508_v37, %v138_v29 }
  0x85   :  { %v130_v44 = vadd.f32 %v126_v36, %v100_v39  ;;  %v59_v39 = vld [vmem:[%s758_s7 + $0x18] sm:$0xff] }
  0x87   :  { %v146_v30 = vpop.permute.xlu1 %145  ;;  %v90_v31 = vpop.permute.xlu0 %89 }
  0x88   :  { %v101_v41 = vmul.f32 %v506_v35, %v90_v31  ;;  %v157_v48 = vmul.f32 %v508_v37, %v146_v30 }
  0x8a   :  { %v131_v45 = vadd.f32 %v127_v40, %v101_v41 }
  0x8b   :  { %v80_v34 = vpop.permute.xlu0 %79 }
  0x8c   :  { %v108_v32 = vpop.permute.xlu1 %107  ;;  %v161_v51 = vadd.f32 %v157_v48, %v131_v45  ;;  %v99_v53 = vmul.f32 %v506_v35, %v80_v34 }
  0x8d   :  { %v125_v54 = vmul.f32 %v507_v33, %v108_v32 }
  0x8f   :  { %v75_v43 = vpop.permute.xlu0 %74  ;;  %v129_v59 = vadd.f32 %v125_v54, %v99_v53 }
  0x90   :  { %v98_v62 = vmul.f32 %v506_v35, %v75_v43 }
  0x91   :  { %v142_v38 = vpop.permute.xlu1 %141  ;;  %v159_v2 = vadd.f32 %v155_v58, %v129_v59 }
  0x92   :  { %v156_v42 = vmul.f32 %v508_v37, %v142_v38  ;;  %v58_v38 = vld [vmem:[%s758_s7 + $0x10] sm:$0xff] }
  0x93   :  { %v175_v49 = vpop.permute.xlu0 %174 }
  0x94   :  { %v160_v46 = vadd.f32 %v156_v42, %v130_v44 }
  0x96   :  { %v104_v47 = vpop.permute.xlu1 %103  ;;  %v184_v50 = vadd.f32 %v175_v49, %v160_v46 }
  0x97   :  { %v124_v63 = vmul.f32 %v507_v33, %v104_v47  ;;  %v216_v17 = vpop.permute.xlu0 %215 }
  0x98   :  { %v192_v56 = vmul.f32 0.01, %v184_v50  ;;  %vm188_vm2 = vcmp.gt.f32.partialorder %v184_v50, 0.0 }
  0x99   :  { %v128_v4 = vadd.f32 %v124_v63, %v98_v62 }
  0x9a   :  { %v196_v0 = vsel %vm188_vm2, %v184_v50, %v192_v56 }
  0x9b   :  { %v180_v52 = vpop.permute.xlu1 %179  ;;  %v206_v21 = vpop.permute.xlu0 %205 }
  0x9c   :  { %v185_v55 = vadd.f32 %v180_v52, %v161_v51 }
  0x9e   :  { %vm189_vm1 = vcmp.gt.f32.partialorder %v185_v55, 0.0  ;;  %v193_v57 = vmul.f32 0.01, %v185_v55 }
  0x9f   :  { %v331_v40 = vpop.permute.xlu0 %330 }
  0xa0   :  { %v134_v60 = vpop.permute.xlu1 %133  ;;  %v197_v61 = vsel %vm189_vm1, %v185_v55, %v193_v57 }
  0xa1   :  { %533 = vmatprep.subr.mxu0 %v197_v61  ;;  %v154_v1 = vmul.f32 %v508_v37, %v134_v60  ;;  %v57_v37 = vld [vmem:[%s758_s7 + $0x8] sm:$0xff] }
  0xa2   :  { %534 = vmatpush3.msra.mxu0 %v197_v61 }
  0xa3   :  { %535 = vmatprep.subr.mxu0 %v196_v0  ;;  %v158_v7 = vadd.f32 %v154_v1, %v128_v4  ;;  %v341_v42 = vpop.permute.xlu0 %340 }
  0xa4   :  { %536 = vmatpush3.msra.mxu0 %v196_v0 }
  0xa5   :  { %v170_v3 = vpop.permute.xlu1 %169 }
  0xa6   :  { %v183_v5 = vadd.f32 %v170_v3, %v159_v2 }
  0xa7   :  { %v460_v50 = vpop.permute.xlu0 %459 }
  0xa8   :  { %v191_v6 = vmul.f32 0.01, %v183_v5  ;;  %vm187_vm3 = vcmp.gt.f32.partialorder %v183_v5, 0.0 }
  0xa9   :  { %v165_v8 = vpop.permute.xlu1 %164 }
  0xaa   :  { %v182_v9 = vadd.f32 %v165_v8, %v158_v7  ;;  %v195_v10 = vsel %vm187_vm3, %v183_v5, %v191_v6  ;;  %v495_v6 = vlaneseq }
  0xab   :  { %537 = vmatprep.subr.mxu0 %v195_v10  ;;  %v470_v62 = vpop.permute.xlu0 %469 }
  0xac   :  { %v190_v11 = vmul.f32 0.01, %v182_v9  ;;  %538 = vmatpush3.msra.mxu0 %v195_v10  ;;  %vm186_vm4 = vcmp.gt.f32.partialorder %v182_v9, 0.0 }
  0xad   :  { %v211_v18 = vpop.permute.xlu1 %210 }
  0xae   :  { %v194_v12 = vsel %vm186_vm4, %v182_v9, %v190_v11  ;;  %v496_v9 = vshrl.u32 %v495_v6, 7 }
  0xaf   :  { %539 = vmatprep.subr.mxu0 %v194_v12 }
  0xb0   :  { %540 = vmatpush3.msra.mxu0 %v194_v12  ;;  %v497_v12 = vsub.s32 0, %v496_v9 }
  0xb1   :  { %542 = vmatmul.mubr.msk.f32.vlgmr.msra.gmra.mxu0 %vm218_vm0, %v49_v13  ;;  %v201_v25 = vpop.permute.xlu1 %200 }
  0xb2   :  { %544 = vmatprep.mubr.msk.f32.mxu0 %vm218_vm0, %v50_v14  ;;  %v493_v14 = vpop.permute.xlu0 %492 }
  0xb3   :  { %v498_v16 = vrot.slane %v493_v14, %v497_v12 }
  0xb5   :  { %545 = vmatmul.mubr.msk.f32.gmra.mxu0 %vm218_vm0, %v51_v15  ;;  %v336_v41 = vpop.permute.xlu1 %335 }
  0xb9   :  { %v346_v44 = vpop.permute.xlu1 %345 }
  0xbd   :  { %v465_v54 = vpop.permute.xlu1 %464 }
  0xc1   :  { %v475_v3 = vpop.permute.xlu1 %474 }
 0x171   :  { %v543_v19 = vpop.f32.mrf.mxu0 }
 0x172   :  { %v303_v23 = vadd.f32 %v543_v19, %v206_v21 }
 0x173   :  { %v297_v20 = vpop.f32.mrf.mxu0 }
 0x174   :  { %v298_v27 = vadd.f32 %v297_v20, %v201_v25  ;;  %v321_v30 = vmul.f32 0.01, %v303_v23  ;;  %vm317_vm7 = vcmp.gt.f32.partialorder %v303_v23, 0.0 }
 0x175   :  { %v546_v22 = vpop.f32.mrf.mxu0 }
 0x176   :  { %v313_v24 = vadd.f32 %v546_v22, %v216_v17  ;;  %v320_v33 = vmul.f32 0.01, %v298_v27  ;;  %vm316_vm8 = vcmp.gt.f32.partialorder %v298_v27, 0.0  ;;  %v325_v35 = vsel %vm317_vm7, %v303_v23, %v321_v30 }
 0x177   :  { %v307_v26 = vpop.f32.mrf.mxu0 }
 0x178   :  { %v308_v28 = vadd.f32 %v307_v26, %v211_v18  ;;  %vm319_vm5 = vcmp.gt.f32.partialorder %v313_v24, 0.0  ;;  %v323_v29 = vmul.f32 0.01, %v313_v24  ;;  %v324_v36 = vsel %vm316_vm8, %v298_v27, %v320_v33 }
 0x17a   :  { %v322_v31 = vmul.f32 0.01, %v308_v28  ;;  %v327_v32 = vsel %vm319_vm5, %v313_v24, %v323_v29  ;;  %vm318_vm6 = vcmp.gt.f32.partialorder %v308_v28, 0.0 }
 0x17b   :  { %547 = vmatprep.subr.mxu1 %v327_v32 }
 0x17c   :  { %548 = vmatpush3.msra.mxu1 %v327_v32  ;;  %v326_v34 = vsel %vm318_vm6, %v308_v28, %v322_v31 }
 0x17d   :  { %549 = vmatprep.subr.mxu1 %v326_v34 }
 0x17e   :  { %550 = vmatpush3.msra.mxu1 %v326_v34 }
 0x17f   :  { %551 = vmatprep.subr.mxu1 %v325_v35 }
 0x180   :  { %552 = vmatpush3.msra.mxu1 %v325_v35 }
 0x181   :  { %553 = vmatprep.subr.mxu1 %v324_v36 }
 0x182   :  { %554 = vmatpush3.msra.mxu1 %v324_v36 }
 0x183   :  { %556 = vmatmul.mubr.msk.f32.vlgmr.msra.gmra.mxu1 %vm218_vm0, %v57_v37 }
 0x184   :  { %558 = vmatprep.mubr.msk.f32.mxu1 %vm218_vm0, %v58_v38 }
 0x187   :  { %559 = vmatmul.mubr.msk.f32.gmra.mxu1 %vm218_vm0, %v59_v39 }
 0x243   :  { %v557_v43 = vpop.f32.mrf.mxu1 }
 0x244   :  { %v432_v45 = vadd.f32 %v557_v43, %v336_v41 }
 0x245   :  { %v426_v46 = vpop.f32.mrf.mxu1 }
 0x246   :  { %v450_v47 = vmul.f32 0.01, %v432_v45  ;;  %v427_v48 = vadd.f32 %v426_v46, %v331_v40  ;;  %vm446_vm9 = vcmp.gt.f32.partialorder %v432_v45, 0.0 }
 0x247   :  { %v560_v49 = vpop.f32.mrf.mxu1 }
 0x248   :  { %vm445_vm10 = vcmp.gt.f32.partialorder %v427_v48, 0.0  ;;  %v449_v51 = vmul.f32 0.01, %v427_v48  ;;  %v442_v52 = vadd.f32 %v560_v49, %v346_v44  ;;  %v454_v55 = vsel %vm446_vm9, %v432_v45, %v450_v47 }
 0x249   :  { %v436_v53 = vpop.f32.mrf.mxu1  ;;  %v478_v61 = vmul.f32 %v465_v54, %v454_v55 }
 0x24a   :  { %v453_v56 = vsel %vm445_vm10, %v427_v48, %v449_v51  ;;  %v452_v57 = vmul.f32 0.01, %v442_v52  ;;  %v437_v58 = vadd.f32 %v436_v53, %v341_v42  ;;  %vm448_vm11 = vcmp.gt.f32.partialorder %v442_v52, 0.0 }
 0x24b   :  { %v477_v59 = vmul.f32 %v460_v50, %v453_v56 }
 0x24c   :  { %vm447_vm12 = vcmp.gt.f32.partialorder %v437_v58, 0.0  ;;  %v451_v60 = vmul.f32 0.01, %v437_v58  ;;  %v456_v63 = vsel %vm448_vm11, %v442_v52, %v452_v57 }
 0x24d   :  { %v481_v1 = vadd.f32 %v478_v61, %v477_v59  ;;  %v480_v4 = vmul.f32 %v475_v3, %v456_v63 }
 0x24e   :  { %v455_v0 = vsel %vm447_vm12, %v437_v58, %v451_v60 }
 0x24f   :  { %v479_v2 = vmul.f32 %v470_v62, %v455_v0 }
 0x251   :  { %v482_v5 = vadd.f32 %v481_v1, %v479_v2 }
 0x253   :  { %v483_v7 = vadd.f32 %v482_v5, %v480_v4 }
 0x255   :  { %v484_v8 = vrot.slane %v483_v7, 4 }
 0x257   :  { %v485_v10 = vadd.f32 %v484_v8, %v483_v7 }
 0x259   :  { %v486_v11 = vrot.slane %v485_v10, 2 }
 0x25b   :  { %v487_v13 = vadd.f32 %v486_v11, %v485_v10 }
 0x25d   :  { %v488_v15 = vrot.slane %v487_v13, 1 }
 0x25f   :  { %v489_v17 = vadd.f32 %v488_v15, %v487_v13 }
 0x261   :  { %v499_v18 = vadd.f32 %v498_v16, %v489_v17 }
 0x263   :  { %576 = vtanh.f32 %v499_v18 }
 0x270   :  { %v577_v19 = vpop.eup %576 }
 0x271   :  { %501 = vst [vmem:[%s759_s11] sm:$0x1] %v577_v19 }

</bundles_post_ra>
